<compile_context>
chip_gen: v6e
topology: v6e:2x2x1
jax: 0.10.0
libtpu: 0.0.40
codegen_flags: <defaults>
</compile_context>

<pallas_src>
import math
import functools

import jax
import jax.numpy as jnp
from jax.experimental import pallas as pl
from jax.experimental.pallas import tpu as pltpu

LN_EPS = 1e-5           # nn.LayerNorm default
MASK_NEG = -100000.0    # additive mask constant from the PyTorch module


def _silu(x):
    # numerically stable sigmoid via tanh (EUP): sigmoid(x) = 0.5*(tanh(x/2)+1)
    return x * (0.5 * (jnp.tanh(0.5 * x) + 1.0))


def _layer_norm(v, gamma, beta):
    mu = jnp.mean(v, axis=-1, keepdims=True)
    var = jnp.mean((v - mu) ** 2, axis=-1, keepdims=True)
    return (v - mu) * jax.lax.rsqrt(var + LN_EPS) * gamma + beta


def _tsa_kernel(x_ref, mask_ref, emb_ref,
                wqkv_ref, bqkv_ref, vecs_ref, we_ref, be_ref, wo_ref,
                out_ref, *, num_head, compute_dtype):
    x = x_ref[0]                                  # (T, D) for this batch
    T, D = x.shape
    H = num_head
    Dh = D // H
    cd = compute_dtype

    # packed per-feature vectors: rows = [gx, bx, gy, by, bo, 0, 0, 0]
    gx = vecs_ref[0:1, :]
    bx = vecs_ref[1:2, :]
    gy = vecs_ref[2:3, :]
    by = vecs_ref[3:4, :]
    bo = vecs_ref[4:5, :]

    # --- LayerNorm + fused QKV projection (one (T,D) @ (D,3D) matmul) --------
    xn = _layer_norm(x, gx, bx)
    qkv = jnp.dot(xn.astype(cd), wqkv_ref[...],
                  preferred_element_type=jnp.float32) + bqkv_ref[...]   # (T, 3D) f32
    qkv_c = qkv.astype(cd)                        # no-op when cd == f32

    # Per-batch additive mask (VPU, computed from the raw 0/1 src_mask tile).
    bias = (1.0 - mask_ref[0]) * jnp.float32(MASK_NEG)                  # (T, T)

    # --- per-head attention ---------------------------------------------------
    # H is small & static -> unrolled; head outputs are concatenated once so y
    # is assembled with a single lane-dense write instead of H partial stores.
    # 1/sqrt(Dh) is already folded into wq / bq at pack time.
    # TODO(synk): attention dropout / output dropout are eval-mode identities.
    head_outs = []
    for h in range(H):
        qh = qkv_c[:, h * Dh:(h + 1) * Dh]                  # (T, Dh)
        kh = qkv_c[:, D + h * Dh:D + (h + 1) * Dh]          # (T, Dh)
        vh = qkv_c[:, 2 * D + h * Dh:2 * D + (h + 1) * Dh]  # (T, Dh)
        s = jax.lax.dot_general(qh, kh, (((1,), (1,)), ((), ())),
                                preferred_element_type=jnp.float32) + bias
        s = s - jnp.max(s, axis=-1, keepdims=True)
        p = jnp.exp(s)                                      # softmax kept in f32
        p = p * pl.reciprocal(jnp.sum(p, axis=-1, keepdims=True), approx=False)
        head_outs.append(jnp.dot(p.astype(cd), vh,
                                 preferred_element_type=jnp.float32))
    y = jnp.concatenate(head_outs, axis=-1)                 # (T, D)

    # --- StylizationBlock -----------------------------------------------------
    emb = emb_ref[0]                              # (1, E)
    se = _silu(emb)
    eo = jnp.dot(se.astype(cd), we_ref[...],
                 preferred_element_type=jnp.float32) + be_ref[...]      # (1, 2D)
    scale = eo[:, :D]                             # (1, D)
    shift = eo[:, D:]                             # (1, D)

    hn = _layer_norm(y, gy, by)                   # (T, D)
    hm = hn * (1.0 + scale) + shift               # row broadcast, pure VPU
    hs = _silu(hm)
    ho = jnp.dot(hs.astype(cd), wo_ref[...],
                 preferred_element_type=jnp.float32) + bo

    out_ref[0] = (x + ho).astype(out_ref.dtype)


def pack_params(params, num_head, compute_dtype=jnp.float32):
    """One-time (init-time) parameter packing; not rebuilt per call."""
    D = params["wq"].shape[0]
    f32 = jnp.float32
    inv_scale = jnp.float32(1.0 / math.sqrt(D // num_head))
    # Fold 1/sqrt(Dh) into the query projection (exact).
    wq_s = params["wq"] * inv_scale
    bq_s = params["bq"] * inv_scale
    wqkv = jnp.concatenate([wq_s, params["wk"], params["wv"]], axis=1)  # (D, 3D)
    bqkv = jnp.concatenate([bq_s, params["bk"], params["bv"]], axis=1)  # (1, 3D)
    vecs = jnp.concatenate([params["gx"], params["bx"], params["gy"],
                            params["by"], params["bo"],
                            jnp.zeros((3, D), f32)], axis=0)            # (8, D)
    return {
        "wqkv": wqkv.astype(compute_dtype),
        "bqkv": bqkv.astype(f32),
        "vecs": vecs.astype(f32),
        "we": params["we"].astype(compute_dtype),
        "be": params["be"].astype(f32),
        "wo": params["wo"].astype(compute_dtype),
        "compute_dtype": compute_dtype,
        "num_head": num_head,
    }


def temporal_self_attention(x, emb, src_mask, packed):
    """x: (B,T,D) f32, emb: (B,1,E) f32, src_mask: (B,T,T) in {0,1} -> (B,T,D)."""
    B, T, D = x.shape
    E = emb.shape[-1]
    f32 = jnp.float32
    num_head = packed["num_head"]
    assert D % num_head == 0

    def const_spec(arr):
        nd = arr.ndim
        return pl.BlockSpec(arr.shape, lambda b, _nd=nd: (0,) * _nd)

    in_specs = [
        pl.BlockSpec((1, T, D), lambda b: (b, 0, 0)),   # x
        pl.BlockSpec((1, T, T), lambda b: (b, 0, 0)),   # src_mask
        pl.BlockSpec((1, 1, E), lambda b: (b, 0, 0)),   # emb
        const_spec(packed["wqkv"]),
        const_spec(packed["bqkv"]),
        const_spec(packed["vecs"]),
        const_spec(packed["we"]),
        const_spec(packed["be"]),
        const_spec(packed["wo"]),
    ]
    out_specs = pl.BlockSpec((1, T, D), lambda b: (b, 0, 0))

    kernel = functools.partial(_tsa_kernel, num_head=num_head,
                               compute_dtype=packed["compute_dtype"])

    out = pl.pallas_call(
        kernel,
        out_shape=jax.ShapeDtypeStruct((B, T, D), f32),
        grid=(B,),
        in_specs=in_specs,
        out_specs=out_specs,
        compiler_params=pltpu.CompilerParams(
            dimension_semantics=("parallel",),          # megacore split on v7x
            vmem_limit_bytes=48 * 1024 * 1024),          # fits v7x 64 MiB VMEM
    )(x.astype(f32), src_mask.astype(f32), emb.astype(f32),
      packed["wqkv"], packed["bqkv"], packed["vecs"],
      packed["we"], packed["be"], packed["wo"])
    return out


def reference(x, emb, src_mask, params, num_head):
    """Pure-JAX mirror of the PyTorch forward (eval mode)."""
    B, T, D = x.shape
    H = num_head
    Dh = D // H

    def ln(v, g, b):
        mu = v.mean(-1, keepdims=True)
        var = ((v - mu) ** 2).mean(-1, keepdims=True)
        return (v - mu) / jnp.sqrt(var + LN_EPS) * g + b

    xn = ln(x, params["gx"][0], params["bx"][0])
    q = (xn @ params["wq"] + params["bq"][0]).reshape(B, T, H, Dh)
    k = (xn @ params["wk"] + params["bk"][0]).reshape(B, T, H, Dh)
    v = (xn @ params["wv"] + params["bv"][0]).reshape(B, T, H, Dh)
    att = jnp.einsum("bnhd,bmhd->bnmh", q, k) / math.sqrt(D // H)
    att = att + (1.0 - src_mask[..., None]) * MASK_NEG
    w = jax.nn.softmax(att, axis=2)
    y = jnp.einsum("bnmh,bmhd->bnhd", w, v).reshape(B, T, D)

    e = emb[:, 0, :]
    se = e * jax.nn.sigmoid(e)
    eo = se @ params["we"] + params["be"][0]
    scale = eo[:, None, :D]
    shift = eo[:, None, D:]
    hn = ln(y, params["gy"][0], params["by"][0])
    hm = hn * (1.0 + scale) + shift
    hs = hm * jax.nn.sigmoid(hm)
    ho = hs @ params["wo"] + params["bo"][0]
    return x + ho


def make_params(key, D, E):
    # NOTE: in the PyTorch module `proj_out.out_layers[-1]` is zero-initialized
    # (zero_module), which would make the block a residual no-op (y == x). We
    # use small deterministic random weights so the full compute path is exercised.
    ks = jax.random.split(key, 10)
    f32 = jnp.float32
    return {
        "gx": jnp.ones((1, D), f32), "bx": jnp.zeros((1, D), f32),
        "wq": 0.1 * jax.random.normal(ks[0], (D, D), f32),
        "bq": 0.1 * jax.random.normal(ks[1], (1, D), f32),
        "wk": 0.1 * jax.random.normal(ks[2], (D, D), f32),
        "bk": 0.1 * jax.random.normal(ks[3], (1, D), f32),
        "wv": 0.1 * jax.random.normal(ks[4], (D, D), f32),
        "bv": 0.1 * jax.random.normal(ks[5], (1, D), f32),
        "we": 0.1 * jax.random.normal(ks[6], (E, 2 * D), f32),
        "be": 0.1 * jax.random.normal(ks[7], (1, 2 * D), f32),
        "gy": jnp.ones((1, D), f32), "by": jnp.zeros((1, D), f32),
        "wo": 0.1 * jax.random.normal(ks[8], (D, D), f32),
        "bo": 0.1 * jax.random.normal(ks[9], (1, D), f32),
    }


if __name__ == "__main__":
    # Shapes implied by the forward: seq_len T, latent_dim D, num_head H,
    # time_embed_dim E.
    B, T, D = 2, 8, 32
    H = 4
    E = 64

    key = jax.random.PRNGKey(0)
    kx, kemb, kp = jax.random.split(key, 3)
    x = jax.random.normal(kx, (B, T, D), jnp.float32)
    emb = jax.random.normal(kemb, (B, 1, E), jnp.float32)
    # causal-style temporal src_mask (every query attends to >= 1 key)
    src_mask = jnp.broadcast_to(jnp.tril(jnp.ones((T, T), jnp.float32)), (B, T, T))
    params = make_params(kp, D, E)

    # Init-time packing (use compute_dtype=jnp.bfloat16 on v6e/v7x for MXU-native
    # weights; f32 here to keep exact parity with the reference at toy sizes).
    packed = pack_params(params, num_head=H, compute_dtype=jnp.float32)

    out = temporal_self_attention(x, emb, src_mask, packed)
    out = jax.block_until_ready(out)

    ref = reference(x, emb, src_mask, params, num_head=H)
    assert out.shape == (B, T, D)
    err = float(jnp.max(jnp.abs(out - ref)))
    assert jnp.allclose(out, ref, rtol=1e-4, atol=1e-4), err

    print("KERNEL_OK")
</pallas_src>

<mosaic_0001>
module attributes {stable_mosaic.version = 11 : i64} {
  func.func @_tsa_kernel(%arg0: i32, %arg1: memref<1x8x32xf32, #tpu.memory_space<vmem>>, %arg2: memref<1x8x8xf32, #tpu.memory_space<vmem>>, %arg3: memref<1x1x64xf32, #tpu.memory_space<vmem>>, %arg4: memref<32x96xf32, #tpu.memory_space<vmem>>, %arg5: memref<1x96xf32, #tpu.memory_space<vmem>>, %arg6: memref<8x32xf32, #tpu.memory_space<vmem>>, %arg7: memref<64x64xf32, #tpu.memory_space<vmem>>, %arg8: memref<1x64xf32, #tpu.memory_space<vmem>>, %arg9: memref<32x32xf32, #tpu.memory_space<vmem>>, %arg10: memref<1x8x32xf32, #tpu.memory_space<vmem>>) attributes {dimension_semantics = [#tpu.dimension_semantics<parallel>], iteration_bounds = array<i64: 2>, scalar_prefetch = 0 : i64, scratch_operands = 0 : i64, tpu.core_type = #tpu.core_type<tc>, window_params = [{transform_indices = @transform_0, window_bounds = array<i64: 1, 8, 32>}, {transform_indices = @transform_1, window_bounds = array<i64: 1, 8, 8>}, {transform_indices = @transform_2, window_bounds = array<i64: 1, 1, 64>}, {pipeline_mode = #tpu.pipeline_mode<synchronous>, transform_indices = @transform_3, window_bounds = array<i64: 32, 96>}, {pipeline_mode = #tpu.pipeline_mode<synchronous>, transform_indices = @transform_4, window_bounds = array<i64: 1, 96>}, {pipeline_mode = #tpu.pipeline_mode<synchronous>, transform_indices = @transform_5, window_bounds = array<i64: 8, 32>}, {pipeline_mode = #tpu.pipeline_mode<synchronous>, transform_indices = @transform_6, window_bounds = array<i64: 64, 64>}, {pipeline_mode = #tpu.pipeline_mode<synchronous>, transform_indices = @transform_7, window_bounds = array<i64: 1, 64>}, {pipeline_mode = #tpu.pipeline_mode<synchronous>, transform_indices = @transform_8, window_bounds = array<i64: 32, 32>}, {transform_indices = @transform_9, window_bounds = array<i64: 1, 8, 32>}]} {
    %c0 = arith.constant 0 : index
    %c0_0 = arith.constant 0 : index
    %c0_1 = arith.constant 0 : index
    %0 = vector.load %arg1[%c0, %c0_0, %c0_1] : memref<1x8x32xf32, #tpu.memory_space<vmem>>, vector<1x8x32xf32>
    %1 = vector.shape_cast %0 : vector<1x8x32xf32> to vector<8x32xf32>
    %c0_2 = arith.constant 0 : index
    %c0_3 = arith.constant 0 : index
    %2 = vector.load %arg6[%c0_2, %c0_3] : memref<8x32xf32, #tpu.memory_space<vmem>>, vector<1x32xf32>
    %c1 = arith.constant 1 : index
    %c0_4 = arith.constant 0 : index
    %3 = vector.load %arg6[%c1, %c0_4] : memref<8x32xf32, #tpu.memory_space<vmem>>, vector<1x32xf32>
    %c2 = arith.constant 2 : index
    %c0_5 = arith.constant 0 : index
    %4 = vector.load %arg6[%c2, %c0_5] : memref<8x32xf32, #tpu.memory_space<vmem>>, vector<1x32xf32>
    %c3 = arith.constant 3 : index
    %c0_6 = arith.constant 0 : index
    %5 = vector.load %arg6[%c3, %c0_6] : memref<8x32xf32, #tpu.memory_space<vmem>>, vector<1x32xf32>
    %c4 = arith.constant 4 : index
    %c0_7 = arith.constant 0 : index
    %6 = vector.load %arg6[%c4, %c0_7] : memref<8x32xf32, #tpu.memory_space<vmem>>, vector<1x32xf32>
    %cst = arith.constant dense<0.000000e+00> : vector<8xf32>
    %7 = vector.multi_reduction <add>, %1, %cst [1] : vector<8x32xf32> to vector<8xf32>
    %8 = vector.shape_cast %7 : vector<8xf32> to vector<8x1xf32>
    %cst_8 = arith.constant 3.200000e+01 : f32
    %9 = vector.broadcast %cst_8 : f32 to vector<8x1xf32>
    %10 = arith.divf %8, %9 : vector<8x1xf32>
    %11 = vector.broadcast %10 : vector<8x1xf32> to vector<8x32xf32>
    %12 = arith.subf %1, %11 : vector<8x32xf32>
    %13 = arith.mulf %12, %12 : vector<8x32xf32>
    %cst_9 = arith.constant dense<0.000000e+00> : vector<8xf32>
    %14 = vector.multi_reduction <add>, %13, %cst_9 [1] : vector<8x32xf32> to vector<8xf32>
    %15 = vector.shape_cast %14 : vector<8xf32> to vector<8x1xf32>
    %cst_10 = arith.constant 3.200000e+01 : f32
    %16 = vector.broadcast %cst_10 : f32 to vector<8x1xf32>
    %17 = arith.divf %15, %16 : vector<8x1xf32>
    %18 = vector.broadcast %10 : vector<8x1xf32> to vector<8x32xf32>
    %19 = arith.subf %1, %18 : vector<8x32xf32>
    %cst_11 = arith.constant 9.99999974E-6 : f32
    %20 = vector.broadcast %cst_11 : f32 to vector<8x1xf32>
    %21 = arith.addf %17, %20 : vector<8x1xf32>
    %22 = math.rsqrt %21 : vector<8x1xf32>
    %23 = vector.broadcast %22 : vector<8x1xf32> to vector<8x32xf32>
    %24 = arith.mulf %19, %23 : vector<8x32xf32>
    %25 = vector.broadcast %2 : vector<1x32xf32> to vector<8x32xf32>
    %26 = arith.mulf %24, %25 : vector<8x32xf32>
    %27 = vector.broadcast %3 : vector<1x32xf32> to vector<8x32xf32>
    %28 = arith.addf %26, %27 : vector<8x32xf32>
    %c0_12 = arith.constant 0 : index
    %c0_13 = arith.constant 0 : index
    %29 = vector.load %arg4[%c0_12, %c0_13] : memref<32x96xf32, #tpu.memory_space<vmem>>, vector<32x96xf32>
    %cst_14 = arith.constant dense<0.000000e+00> : vector<8x96xf32>
    %30 = tpu.matmul %28, %29, %cst_14 {dimension_numbers = #tpu.dot_dimension_numbers<[1], [0], [0], [1], [0, 0, 1, 1], [], []>} : vector<8x32xf32>, vector<32x96xf32>, vector<8x96xf32> -> vector<8x96xf32>
    %c0_15 = arith.constant 0 : index
    %c0_16 = arith.constant 0 : index
    %31 = vector.load %arg5[%c0_15, %c0_16] : memref<1x96xf32, #tpu.memory_space<vmem>>, vector<1x96xf32>
    %32 = vector.broadcast %31 : vector<1x96xf32> to vector<8x96xf32>
    %33 = arith.addf %30, %32 : vector<8x96xf32>
    %c0_17 = arith.constant 0 : index
    %c0_18 = arith.constant 0 : index
    %c0_19 = arith.constant 0 : index
    %34 = vector.load %arg2[%c0_17, %c0_18, %c0_19] : memref<1x8x8xf32, #tpu.memory_space<vmem>>, vector<1x8x8xf32>
    %35 = vector.shape_cast %34 : vector<1x8x8xf32> to vector<8x8xf32>
    %cst_20 = arith.constant 1.000000e+00 : f32
    %36 = vector.broadcast %cst_20 : f32 to vector<8x8xf32>
    %37 = arith.subf %36, %35 : vector<8x8xf32>
    %cst_21 = arith.constant -1.000000e+05 : f32
    %38 = vector.broadcast %cst_21 : f32 to vector<8x8xf32>
    %39 = arith.mulf %37, %38 : vector<8x8xf32>
    %40 = vector.extract_strided_slice %33 {offsets = [0, 0], sizes = [8, 8], strides = [1, 1]} : vector<8x96xf32> to vector<8x8xf32>
    %41 = vector.extract_strided_slice %33 {offsets = [0, 32], sizes = [8, 8], strides = [1, 1]} : vector<8x96xf32> to vector<8x8xf32>
    %42 = vector.extract_strided_slice %33 {offsets = [0, 64], sizes = [8, 8], strides = [1, 1]} : vector<8x96xf32> to vector<8x8xf32>
    %cst_22 = arith.constant dense<0.000000e+00> : vector<8x8xf32>
    %43 = tpu.matmul %40, %41, %cst_22 {dimension_numbers = #tpu.dot_dimension_numbers<[1], [1], [0], [0], [0, 0, 1, 0], [], []>} : vector<8x8xf32>, vector<8x8xf32>, vector<8x8xf32> -> vector<8x8xf32>
    %44 = arith.addf %43, %39 : vector<8x8xf32>
    %cst_23 = arith.constant dense<0xFF800000> : vector<8xf32>
    %45 = vector.multi_reduction <maximumf>, %44, %cst_23 [1] : vector<8x8xf32> to vector<8xf32>
    %46 = vector.shape_cast %45 : vector<8xf32> to vector<8x1xf32>
    %47 = vector.broadcast %46 : vector<8x1xf32> to vector<8x8xf32>
    %48 = arith.subf %44, %47 : vector<8x8xf32>
    %49 = math.exp %48 : vector<8x8xf32>
    %cst_24 = arith.constant dense<0.000000e+00> : vector<8xf32>
    %50 = vector.multi_reduction <add>, %49, %cst_24 [1] : vector<8x8xf32> to vector<8xf32>
    %51 = vector.shape_cast %50 : vector<8xf32> to vector<8x1xf32>
    %52 = tpu.reciprocal %51 : vector<8x1xf32> -> vector<8x1xf32>
    %53 = vector.broadcast %52 : vector<8x1xf32> to vector<8x8xf32>
    %54 = arith.mulf %49, %53 : vector<8x8xf32>
    %cst_25 = arith.constant dense<0.000000e+00> : vector<8x8xf32>
    %55 = tpu.matmul %54, %42, %cst_25 {dimension_numbers = #tpu.dot_dimension_numbers<[1], [0], [0], [1], [0, 0, 1, 1], [], []>} : vector<8x8xf32>, vector<8x8xf32>, vector<8x8xf32> -> vector<8x8xf32>
    %56 = vector.extract_strided_slice %33 {offsets = [0, 8], sizes = [8, 8], strides = [1, 1]} : vector<8x96xf32> to vector<8x8xf32>
    %57 = vector.extract_strided_slice %33 {offsets = [0, 40], sizes = [8, 8], strides = [1, 1]} : vector<8x96xf32> to vector<8x8xf32>
    %58 = vector.extract_strided_slice %33 {offsets = [0, 72], sizes = [8, 8], strides = [1, 1]} : vector<8x96xf32> to vector<8x8xf32>
    %cst_26 = arith.constant dense<0.000000e+00> : vector<8x8xf32>
    %59 = tpu.matmul %56, %57, %cst_26 {dimension_numbers = #tpu.dot_dimension_numbers<[1], [1], [0], [0], [0, 0, 1, 0], [], []>} : vector<8x8xf32>, vector<8x8xf32>, vector<8x8xf32> -> vector<8x8xf32>
    %60 = arith.addf %59, %39 : vector<8x8xf32>
    %cst_27 = arith.constant dense<0xFF800000> : vector<8xf32>
    %61 = vector.multi_reduction <maximumf>, %60, %cst_27 [1] : vector<8x8xf32> to vector<8xf32>
    %62 = vector.shape_cast %61 : vector<8xf32> to vector<8x1xf32>
    %63 = vector.broadcast %62 : vector<8x1xf32> to vector<8x8xf32>
    %64 = arith.subf %60, %63 : vector<8x8xf32>
    %65 = math.exp %64 : vector<8x8xf32>
    %cst_28 = arith.constant dense<0.000000e+00> : vector<8xf32>
    %66 = vector.multi_reduction <add>, %65, %cst_28 [1] : vector<8x8xf32> to vector<8xf32>
    %67 = vector.shape_cast %66 : vector<8xf32> to vector<8x1xf32>
    %68 = tpu.reciprocal %67 : vector<8x1xf32> -> vector<8x1xf32>
    %69 = vector.broadcast %68 : vector<8x1xf32> to vector<8x8xf32>
    %70 = arith.mulf %65, %69 : vector<8x8xf32>
    %cst_29 = arith.constant dense<0.000000e+00> : vector<8x8xf32>
    %71 = tpu.matmul %70, %58, %cst_29 {dimension_numbers = #tpu.dot_dimension_numbers<[1], [0], [0], [1], [0, 0, 1, 1], [], []>} : vector<8x8xf32>, vector<8x8xf32>, vector<8x8xf32> -> vector<8x8xf32>
    %72 = vector.extract_strided_slice %33 {offsets = [0, 16], sizes = [8, 8], strides = [1, 1]} : vector<8x96xf32> to vector<8x8xf32>
    %73 = vector.extract_strided_slice %33 {offsets = [0, 48], sizes = [8, 8], strides = [1, 1]} : vector<8x96xf32> to vector<8x8xf32>
    %74 = vector.extract_strided_slice %33 {offsets = [0, 80], sizes = [8, 8], strides = [1, 1]} : vector<8x96xf32> to vector<8x8xf32>
    %cst_30 = arith.constant dense<0.000000e+00> : vector<8x8xf32>
    %75 = tpu.matmul %72, %73, %cst_30 {dimension_numbers = #tpu.dot_dimension_numbers<[1], [1], [0], [0], [0, 0, 1, 0], [], []>} : vector<8x8xf32>, vector<8x8xf32>, vector<8x8xf32> -> vector<8x8xf32>
    %76 = arith.addf %75, %39 : vector<8x8xf32>
    %cst_31 = arith.constant dense<0xFF800000> : vector<8xf32>
    %77 = vector.multi_reduction <maximumf>, %76, %cst_31 [1] : vector<8x8xf32> to vector<8xf32>
    %78 = vector.shape_cast %77 : vector<8xf32> to vector<8x1xf32>
    %79 = vector.broadcast %78 : vector<8x1xf32> to vector<8x8xf32>
    %80 = arith.subf %76, %79 : vector<8x8xf32>
    %81 = math.exp %80 : vector<8x8xf32>
    %cst_32 = arith.constant dense<0.000000e+00> : vector<8xf32>
    %82 = vector.multi_reduction <add>, %81, %cst_32 [1] : vector<8x8xf32> to vector<8xf32>
    %83 = vector.shape_cast %82 : vector<8xf32> to vector<8x1xf32>
    %84 = tpu.reciprocal %83 : vector<8x1xf32> -> vector<8x1xf32>
    %85 = vector.broadcast %84 : vector<8x1xf32> to vector<8x8xf32>
    %86 = arith.mulf %81, %85 : vector<8x8xf32>
    %cst_33 = arith.constant dense<0.000000e+00> : vector<8x8xf32>
    %87 = tpu.matmul %86, %74, %cst_33 {dimension_numbers = #tpu.dot_dimension_numbers<[1], [0], [0], [1], [0, 0, 1, 1], [], []>} : vector<8x8xf32>, vector<8x8xf32>, vector<8x8xf32> -> vector<8x8xf32>
    %88 = vector.extract_strided_slice %33 {offsets = [0, 24], sizes = [8, 8], strides = [1, 1]} : vector<8x96xf32> to vector<8x8xf32>
    %89 = vector.extract_strided_slice %33 {offsets = [0, 56], sizes = [8, 8], strides = [1, 1]} : vector<8x96xf32> to vector<8x8xf32>
    %90 = vector.extract_strided_slice %33 {offsets = [0, 88], sizes = [8, 8], strides = [1, 1]} : vector<8x96xf32> to vector<8x8xf32>
    %cst_34 = arith.constant dense<0.000000e+00> : vector<8x8xf32>
    %91 = tpu.matmul %88, %89, %cst_34 {dimension_numbers = #tpu.dot_dimension_numbers<[1], [1], [0], [0], [0, 0, 1, 0], [], []>} : vector<8x8xf32>, vector<8x8xf32>, vector<8x8xf32> -> vector<8x8xf32>
    %92 = arith.addf %91, %39 : vector<8x8xf32>
    %cst_35 = arith.constant dense<0xFF800000> : vector<8xf32>
    %93 = vector.multi_reduction <maximumf>, %92, %cst_35 [1] : vector<8x8xf32> to vector<8xf32>
    %94 = vector.shape_cast %93 : vector<8xf32> to vector<8x1xf32>
    %95 = vector.broadcast %94 : vector<8x1xf32> to vector<8x8xf32>
    %96 = arith.subf %92, %95 : vector<8x8xf32>
    %97 = math.exp %96 : vector<8x8xf32>
    %cst_36 = arith.constant dense<0.000000e+00> : vector<8xf32>
    %98 = vector.multi_reduction <add>, %97, %cst_36 [1] : vector<8x8xf32> to vector<8xf32>
    %99 = vector.shape_cast %98 : vector<8xf32> to vector<8x1xf32>
    %100 = tpu.reciprocal %99 : vector<8x1xf32> -> vector<8x1xf32>
    %101 = vector.broadcast %100 : vector<8x1xf32> to vector<8x8xf32>
    %102 = arith.mulf %97, %101 : vector<8x8xf32>
    %cst_37 = arith.constant dense<0.000000e+00> : vector<8x8xf32>
    %103 = tpu.matmul %102, %90, %cst_37 {dimension_numbers = #tpu.dot_dimension_numbers<[1], [0], [0], [1], [0, 0, 1, 1], [], []>} : vector<8x8xf32>, vector<8x8xf32>, vector<8x8xf32> -> vector<8x8xf32>
    %104 = tpu.concatenate %55, %71, %87, %103 in 1 : vector<8x8xf32>, vector<8x8xf32>, vector<8x8xf32>, vector<8x8xf32> -> vector<8x32xf32>
    %c0_38 = arith.constant 0 : index
    %c0_39 = arith.constant 0 : index
    %c0_40 = arith.constant 0 : index
    %105 = vector.load %arg3[%c0_38, %c0_39, %c0_40] : memref<1x1x64xf32, #tpu.memory_space<vmem>>, vector<1x1x64xf32>
    %106 = vector.shape_cast %105 : vector<1x1x64xf32> to vector<1x64xf32>
    %cst_41 = arith.constant 5.000000e-01 : f32
    %107 = vector.broadcast %cst_41 : f32 to vector<1x64xf32>
    %108 = arith.mulf %107, %106 : vector<1x64xf32>
    %109 = math.tanh %108 : vector<1x64xf32>
    %cst_42 = arith.constant 1.000000e+00 : f32
    %110 = vector.broadcast %cst_42 : f32 to vector<1x64xf32>
    %111 = arith.addf %109, %110 : vector<1x64xf32>
    %cst_43 = arith.constant 5.000000e-01 : f32
    %112 = vector.broadcast %cst_43 : f32 to vector<1x64xf32>
    %113 = arith.mulf %112, %111 : vector<1x64xf32>
    %114 = arith.mulf %106, %113 : vector<1x64xf32>
    %c0_44 = arith.constant 0 : index
    %c0_45 = arith.constant 0 : index
    %115 = vector.load %arg7[%c0_44, %c0_45] : memref<64x64xf32, #tpu.memory_space<vmem>>, vector<64x64xf32>
    %cst_46 = arith.constant dense<0.000000e+00> : vector<1x64xf32>
    %116 = tpu.matmul %114, %115, %cst_46 {dimension_numbers = #tpu.dot_dimension_numbers<[1], [0], [0], [1], [0, 0, 1, 1], [], []>} : vector<1x64xf32>, vector<64x64xf32>, vector<1x64xf32> -> vector<1x64xf32>
    %c0_47 = arith.constant 0 : index
    %c0_48 = arith.constant 0 : index
    %117 = vector.load %arg8[%c0_47, %c0_48] : memref<1x64xf32, #tpu.memory_space<vmem>>, vector<1x64xf32>
    %118 = arith.addf %116, %117 : vector<1x64xf32>
    %119 = vector.extract_strided_slice %118 {offsets = [0, 0], sizes = [1, 32], strides = [1, 1]} : vector<1x64xf32> to vector<1x32xf32>
    %120 = vector.extract_strided_slice %118 {offsets = [0, 32], sizes = [1, 32], strides = [1, 1]} : vector<1x64xf32> to vector<1x32xf32>
    %cst_49 = arith.constant dense<0.000000e+00> : vector<8xf32>
    %121 = vector.multi_reduction <add>, %104, %cst_49 [1] : vector<8x32xf32> to vector<8xf32>
    %122 = vector.shape_cast %121 : vector<8xf32> to vector<8x1xf32>
    %cst_50 = arith.constant 3.200000e+01 : f32
    %123 = vector.broadcast %cst_50 : f32 to vector<8x1xf32>
    %124 = arith.divf %122, %123 : vector<8x1xf32>
    %125 = vector.broadcast %124 : vector<8x1xf32> to vector<8x32xf32>
    %126 = arith.subf %104, %125 : vector<8x32xf32>
    %127 = arith.mulf %126, %126 : vector<8x32xf32>
    %cst_51 = arith.constant dense<0.000000e+00> : vector<8xf32>
    %128 = vector.multi_reduction <add>, %127, %cst_51 [1] : vector<8x32xf32> to vector<8xf32>
    %129 = vector.shape_cast %128 : vector<8xf32> to vector<8x1xf32>
    %cst_52 = arith.constant 3.200000e+01 : f32
    %130 = vector.broadcast %cst_52 : f32 to vector<8x1xf32>
    %131 = arith.divf %129, %130 : vector<8x1xf32>
    %132 = vector.broadcast %124 : vector<8x1xf32> to vector<8x32xf32>
    %133 = arith.subf %104, %132 : vector<8x32xf32>
    %cst_53 = arith.constant 9.99999974E-6 : f32
    %134 = vector.broadcast %cst_53 : f32 to vector<8x1xf32>
    %135 = arith.addf %131, %134 : vector<8x1xf32>
    %136 = math.rsqrt %135 : vector<8x1xf32>
    %137 = vector.broadcast %136 : vector<8x1xf32> to vector<8x32xf32>
    %138 = arith.mulf %133, %137 : vector<8x32xf32>
    %139 = vector.broadcast %4 : vector<1x32xf32> to vector<8x32xf32>
    %140 = arith.mulf %138, %139 : vector<8x32xf32>
    %141 = vector.broadcast %5 : vector<1x32xf32> to vector<8x32xf32>
    %142 = arith.addf %140, %141 : vector<8x32xf32>
    %cst_54 = arith.constant 1.000000e+00 : f32
    %143 = vector.broadcast %cst_54 : f32 to vector<1x32xf32>
    %144 = arith.addf %143, %119 : vector<1x32xf32>
    %145 = vector.broadcast %144 : vector<1x32xf32> to vector<8x32xf32>
    %146 = arith.mulf %142, %145 : vector<8x32xf32>
    %147 = vector.broadcast %120 : vector<1x32xf32> to vector<8x32xf32>
    %148 = arith.addf %146, %147 : vector<8x32xf32>
    %cst_55 = arith.constant 5.000000e-01 : f32
    %149 = vector.broadcast %cst_55 : f32 to vector<8x32xf32>
    %150 = arith.mulf %149, %148 : vector<8x32xf32>
    %151 = math.tanh %150 : vector<8x32xf32>
    %cst_56 = arith.constant 1.000000e+00 : f32
    %152 = vector.broadcast %cst_56 : f32 to vector<8x32xf32>
    %153 = arith.addf %151, %152 : vector<8x32xf32>
    %cst_57 = arith.constant 5.000000e-01 : f32
    %154 = vector.broadcast %cst_57 : f32 to vector<8x32xf32>
    %155 = arith.mulf %154, %153 : vector<8x32xf32>
    %156 = arith.mulf %148, %155 : vector<8x32xf32>
    %c0_58 = arith.constant 0 : index
    %c0_59 = arith.constant 0 : index
    %157 = vector.load %arg9[%c0_58, %c0_59] : memref<32x32xf32, #tpu.memory_space<vmem>>, vector<32x32xf32>
    %cst_60 = arith.constant dense<0.000000e+00> : vector<8x32xf32>
    %158 = tpu.matmul %156, %157, %cst_60 {dimension_numbers = #tpu.dot_dimension_numbers<[1], [0], [0], [1], [0, 0, 1, 1], [], []>} : vector<8x32xf32>, vector<32x32xf32>, vector<8x32xf32> -> vector<8x32xf32>
    %159 = vector.broadcast %6 : vector<1x32xf32> to vector<8x32xf32>
    %160 = arith.addf %158, %159 : vector<8x32xf32>
    %161 = arith.addf %1, %160 : vector<8x32xf32>
    %c0_61 = arith.constant 0 : index
    %c0_62 = arith.constant 0 : index
    %c0_63 = arith.constant 0 : index
    %162 = vector.load %arg10[%c0_61, %c0_62, %c0_63] : memref<1x8x32xf32, #tpu.memory_space<vmem>>, vector<1x8x32xf32>
    %163 = vector.shape_cast %162 : vector<1x8x32xf32> to vector<8x32xf32>
    %164 = vector.shape_cast %161 : vector<8x32xf32> to vector<1x8x32xf32>
    tpu.vector_store %arg10[%c0_61, %c0_62, %c0_63], %164 {strides = array<i32>} : memref<1x8x32xf32, #tpu.memory_space<vmem>>, vector<1x8x32xf32>,
    return
  }
  func.func @transform_0(%arg0: i32) -> (i32, i32, i32) {
    %c0_i32 = arith.constant 0 : i32
    %c0_i32_0 = arith.constant 0 : i32
    %c0_i32_1 = arith.constant 0 : i32
    return %arg0, %c0_i32, %c0_i32_0 : i32, i32, i32
  }
  func.func @transform_1(%arg0: i32) -> (i32, i32, i32) {
    %c0_i32 = arith.constant 0 : i32
    %c0_i32_0 = arith.constant 0 : i32
    %c0_i32_1 = arith.constant 0 : i32
    return %arg0, %c0_i32, %c0_i32_0 : i32, i32, i32
  }
  func.func @transform_2(%arg0: i32) -> (i32, i32, i32) {
    %c0_i32 = arith.constant 0 : i32
    %c0_i32_0 = arith.constant 0 : i32
    %c0_i32_1 = arith.constant 0 : i32
    return %arg0, %c0_i32, %c0_i32_0 : i32, i32, i32
  }
  func.func @transform_3(%arg0: i32) -> (i32, i32) {
    %c0_i32 = arith.constant 0 : i32
    %c0_i32_0 = arith.constant 0 : i32
    %c0_i32_1 = arith.constant 0 : i32
    return %c0_i32, %c0_i32_0 : i32, i32
  }
  func.func @transform_4(%arg0: i32) -> (i32, i32) {
    %c0_i32 = arith.constant 0 : i32
    %c0_i32_0 = arith.constant 0 : i32
    %c0_i32_1 = arith.constant 0 : i32
    return %c0_i32, %c0_i32_0 : i32, i32
  }
  func.func @transform_5(%arg0: i32) -> (i32, i32) {
    %c0_i32 = arith.constant 0 : i32
    %c0_i32_0 = arith.constant 0 : i32
    %c0_i32_1 = arith.constant 0 : i32
    return %c0_i32, %c0_i32_0 : i32, i32
  }
  func.func @transform_6(%arg0: i32) -> (i32, i32) {
    %c0_i32 = arith.constant 0 : i32
    %c0_i32_0 = arith.constant 0 : i32
    %c0_i32_1 = arith.constant 0 : i32
    return %c0_i32, %c0_i32_0 : i32, i32
  }
  func.func @transform_7(%arg0: i32) -> (i32, i32) {
    %c0_i32 = arith.constant 0 : i32
    %c0_i32_0 = arith.constant 0 : i32
    %c0_i32_1 = arith.constant 0 : i32
    return %c0_i32, %c0_i32_0 : i32, i32
  }
  func.func @transform_8(%arg0: i32) -> (i32, i32) {
    %c0_i32 = arith.constant 0 : i32
    %c0_i32_0 = arith.constant 0 : i32
    %c0_i32_1 = arith.constant 0 : i32
    return %c0_i32, %c0_i32_0 : i32, i32
  }
  func.func @transform_9(%arg0: i32) -> (i32, i32, i32) {
    %c0_i32 = arith.constant 0 : i32
    %c0_i32_0 = arith.constant 0 : i32
    %c0_i32_1 = arith.constant 0 : i32
    return %arg0, %c0_i32, %c0_i32_0 : i32, i32, i32
  }
}

</mosaic_0001>

<bundles_post_ra>
// kernel: tpu_custom_call.1
= control target key start
LH: loop header
LB: loop body
LE: loop exit
PB: predicated region body
PF: predicated region fallthrough
CT: control target
= control target key end

     0   :  { %s2609_s0 = inlined_call_operand.hbm [shape: f32[2,8,32], index: 0, kind: input, shape index: {}]   ;;  %s2610_s1 = inlined_call_operand.hbm [shape: f32[2,8,8], index: 1, kind: input, shape index: {}]   ;;  %s2611_s2 = inlined_call_operand.hbm [shape: f32[2,1,64], index: 2, kind: input, shape index: {}]   ;;  %s2612_s3 = inlined_call_operand.hbm [shape: f32[32,96], index: 3, kind: input, shape index: {}]   ;;  %s2613_s4 = inlined_call_operand.vmem [shape: f32[1,96], index: 4, kind: input, shape index: {}]   ;;  %s2614_s5 = inlined_call_operand.vmem [shape: f32[8,32], index: 5, kind: input, shape index: {}]   ;;  %s2615_s6 = inlined_call_operand.hbm [shape: f32[64,64], index: 6, kind: input, shape index: {}]   ;;  %s2616_s7 = inlined_call_operand.vmem [shape: f32[1,64], index: 7, kind: input, shape index: {}]   ;;  %s2617_s8 = inlined_call_operand.hbm [shape: f32[32,32], index: 8, kind: input, shape index: {}]   ;;  %s2618_s9 = inlined_call_operand.hbm [shape: f32[2,8,32], index: 9, kind: output, shape index: {}]  }
   0x1   :  { %2638 = sst [smem:[#allocation24_spill]] %s2609_s0 }
   0x2   :  { %2639 = sst [smem:[#allocation25_spill]] %s2610_s1 }
   0x3   :  { %2640 = sst [smem:[#allocation26_spill]] %s2612_s3 }
   0x4   :  { %2641 = sst [smem:[#allocation27_spill]] %s2618_s9 }
   0x5   :  { %14 = vsyncpa [#allocation3], 0 }
   0x6   :  { %16 = vsyncpa [#allocation3 + $0x1], 0 }
   0x7   :  { %17 = vsyncpa [#allocation6], 0 }
   0x8   :  { %19 = vsyncpa [#allocation6 + $0x1], 0 }
   0x9   :  { %20 = vsyncpa [#allocation9], 0 }
   0xa   :  { %21 = vsyncpa [#allocation12], 0 }
   0xb   :  { %22 = vsyncpa [#allocation4], 0 }
   0xc   :  { %24 = vsyncpa [#allocation4 + $0x1], 0  ;;  %s2226_s30 = smov 0   ;;  %s2228_s10 = smov 0  }
   0xd   :  { %s2230_s11 = smov 0   ;;  %s2232_s12 = smov 0  }
   0xe LB: > { %2642 = sst [smem:[#allocation19_spill]] %s2137_s30  ;;  %s2247_s13 = sadd.s32 4294967295, %s2149_s12   ;;  %s2149_s12 = sphi %s2232_s12, %s2676_s12   ;;  %s2145_s11 = sphi %s2230_s11, %s2678_s11   ;;  %s2141_s10 = sphi %s2228_s10, %s2680_s10   ;;  %s2137_s30 = sphi %s2226_s30, %s2679_s30  }
   0xf   : > { %2643 = sst [smem:[#allocation20_spill]] %s2145_s11  ;;  %s1623_s14 = sadd.s32 4294967294, %s2149_s12  }
  0x10   : > { %p50_p0 = scmp.ne.s32.totalorder %s2141_s10, %s2137_s30  ;;  %p2628_p1 = scmp.eq.s32.totalorder %s2247_s13, 0 }
  0x11   : > { %p252_p2 = scmp.eq.s32.totalorder %s2247_s13, 1  ;;  %p258_p3 = scmp.eq.s32.totalorder %s1623_s14, 1 }
  0x12   : > { %p2256_p4 = por %p2628_p1, %p50_p0  ;;  %p1624_p5 = scmp.ge.s32.totalorder %s2149_s12, 1 }
  0x13   : > { %p2261_p6 = por %p258_p3, %p50_p0  ;;  %p265_p7 = scmp.lt.s32.totalorder %s2149_s12, 3 }
  0x14   : > { %s2644_s15 = scalar_select %p2256_p4, 1, 0 }
  0x15   : > { %s2645_s16 = scalar_select %p2261_p6, 1, 0 }
  0x16   : > { %p2266_p8 = pnand %p1624_p5, %p265_p7  ;;  %s2151_s18 = smov [#allocation8]  }
  0x17   : > { %2646 = sst [smem:[#allocation21_spill]] %s2645_s16  ;;  %s277_s19 = sshll.u32 %s2151_s18, 4  ;;  %s278_s19 = int_to_ptr.vmem [resolvable:$true] %s277_s19 }
  0x18   : > { %s2647_s17 = scalar_select %p2266_p8, 1, 0 }
  0x19   : > { %p1802_p9 = pneg %p2266_p8  ;;  %s2280_s21 = sadd.s32 1, %s2149_s12  }
  0x1a   : > { %2649 = sst [smem:[#allocation22_spill]] %s2280_s21  ;;  %s37_s22 = sadd.s32 1, %s2145_s11 }
  0x1b   : > { %p2275_p11 = pnand %p1802_p9, %p2628_p1  ;;  %s34_s23 = ssub.s32 %s2149_s12, %s2280_s21 }
  0x1c   : > { %s1922_s24 = scalar_lea.vmem %s278_s19, 512  ;;  %p1930_p5 = scmp.lt.s32.totalorder %s278_s19, %s278_s19 }
  0x1d   : > { %s2648_s20 = scalar_select %p2275_p11, 1, 0 }
  0x1e   : > { %p2629_p12 = pneg %p2275_p11  ;;  %p1923_p13 = scmp.ne.s32.totalorder %s278_s19, %s1922_s24 }
  0x1f   : > { %p1931_p7 = scmp.lt.s32.totalorder %s1922_s24, %s1922_s24 }
  0x20   : > { %p1925_p0 = pnand %p1923_p13, %p2629_p12 }
  0x21   : > { %p1932_p9 = por %p1931_p7, %p1930_p5 }
  0x22   : > { %p1926_p3 = pneg %p1925_p0 }
  0x24   : > { %p1933_p10 = pnand %p1932_p9, %p1926_p3 }
  0x26   : > { %1936 = shalt.err (!%p1933_p10)
}
  0x27   : > { %s2621_s25 = smov 128   ;;  %s2623_s26 = smov 8  }
  0x28   : > { %s2650_s3 = sld [smem:[#allocation26_spill]]  ;;  %p35_p10 = scmp.eq.s32.totalorder %s34_s23, 0 }
  0x29   : > { %p44_p13 = scmp.ne.s32.totalorder %s2145_s11, %s2141_s10  ;;  %p45_p0 = scmp.eq.s32.totalorder %s2149_s12, 0 }
  0x2a   : > { %p1829_p3 = scmp.lt.s32.totalorder %s2149_s12, 2  ;;  %s2312_s18 = sand.u32 1, %s2145_s11  }
  0x2b   : > { %s2303_s29 = scalar_select %p35_p10, %s2145_s11, %s37_s22  }
  0x2c   : > { %p46_p5 = por %p45_p0, %p44_p13  ;;  %p2307_p7 = por %p252_p2, %p44_p13 }
  0x2d   : > { %2651 = sst [smem:[#allocation23_spill]] %s2303_s29  ;;  %s2626_s24 = sshll.u32 %s2149_s12, 7 }
  0x2e   : > { %1805 = dma.hbm_to_vmem [thread:$0]  (!%p2275_p11), %s2650_s3, 512, %s278_s19, [#allocation9], %s2621_s25, %s2621_s25, %s2623_s26  }
  0x2f   : > { %s2652_s14 = scalar_select %p2307_p7, 1, 0 }
  0x30   : > { %s2627_s21 = sshll.u32 %s2312_s18, 3  ;;  %p2316_p9 = pnand %p1829_p3, %p46_p5 }
  0x31   : > { %s344_s23 = sand.u32 1, %s2149_s12   ;;  %s2654_s1 = sld [smem:[#allocation25_spill]] }
  0x32   : > { %s348_s25 = scalar_lea.vmem [#allocation5], %s2627_s21  ;;  %s2330_s3 = scalar_lea.sflag [#allocation6], %s344_s23 }
  0x33   : > { %s355_s26 = sshll.u32 %s348_s25, 4  ;;  %p2336_p10 = pneg %p2316_p9  ;;  %s356_s26 = int_to_ptr.vmem [resolvable:$true] %s355_s26 }
  0x37   : > { %s2326_s28 = scalar_lea.hbm %s2654_s1, %s2626_s24  ;;  %s1942_s24 = scalar_lea.hbm %s2654_s1, 256 }
  0x38   : > { %s1937_s29 = scalar_lea.hbm %s2326_s28, 128  ;;  %p1943_p3 = scmp.lt.s32.totalorder %s2326_s28, %s2654_s1 }
  0x39   : > { %p1938_p2 = scmp.ne.s32.totalorder %s2326_s28, %s1937_s29  ;;  %p1944_p5 = scmp.lt.s32.totalorder %s1942_s24, %s1937_s29 }
  0x3b   : > { %p1940_p13 = pnand %p2336_p10, %p1938_p2  ;;  %p1945_p1 = por %p1944_p5, %p1943_p3 }
  0x3d   : > { %p1941_p0 = pneg %p1940_p13 }
  0x3f   : > { %p1946_p12 = pnand %p1945_p1, %p1941_p0 }
  0x41   : > { %1949 = shalt.err (!%p1946_p12)
}
  0x42   : > { %s1950_s23 = scalar_lea.vmem %s356_s26, 128  ;;  %s2154_s16 = smov [#allocation5]  }
  0x43   : > { %p1951_p6 = scmp.ne.s32.totalorder %s356_s26, %s1950_s23  ;;  %s1955_s30 = sshll.u32 %s2154_s16, 4  ;;  %s1956_s30 = int_to_ptr.vmem [resolvable:$false] %s1955_s30 }
  0x44   : > { %s1957_s9 = scalar_lea.vmem %s1956_s30, 256  ;;  %p1958_p2 = scmp.lt.s32.totalorder %s356_s26, %s1956_s30 }
  0x45   : > { %p1953_p7 = pnand %p1951_p6, %p2336_p10  ;;  %p1959_p13 = scmp.lt.s32.totalorder %s1957_s9, %s1950_s23 }
  0x47   : > { %p1954_p4 = pneg %p1953_p7  ;;  %p1960_p8 = por %p1959_p13, %p1958_p2 }
  0x49   : > { %p1961_p11 = pnand %p1960_p8, %p1954_p4 }
  0x4b   : > { %1964 = shalt.err (!%p1961_p11)
}
  0x4c   : > { %1818 = dma.hbm_to_vmem [thread:$0]  (!%p2316_p9), %s2326_s28, 128, %s356_s26, %s2330_s3  }
  0x4d   : > { %s2155_s21 = smov [#allocation10]   ;;  %s2156_s24 = smov [#allocation11]  }
  0x4e   : > { %s296_s29 = sshll.u32 %s2155_s21, 4  ;;  %s312_s22 = sshll.u32 %s2156_s24, 4  ;;  %s297_s29 = int_to_ptr.vmem [resolvable:$true] %s296_s29  ;;  %s313_s22 = int_to_ptr.vmem [resolvable:$true] %s312_s22 }
  0x4f   : > { %s1976_s27 = scalar_lea.vmem %s297_s29, 1024  ;;  %p2656_p6 = scmp.ne.s32.totalorder %s2648_s20, 0 }
  0x50   : > { %p1977_p1 = scmp.ne.s32.totalorder %s297_s29, %s1976_s27  ;;  %p1984_p3 = scmp.lt.s32.totalorder %s297_s29, %s297_s29 }
  0x51   : > { %p2657_p12 = pneg %p2656_p6  ;;  %p1985_p4 = scmp.lt.s32.totalorder %s1976_s27, %s1976_s27 }
  0x53   : > { %p1979_p7 = pnand %p1977_p1, %p2657_p12  ;;  %p1986_p8 = por %p1985_p4, %p1984_p3 }
  0x55   : > { %p1980_p0 = pneg %p1979_p7 }
  0x57   : > { %p1987_p11 = pnand %p1986_p8, %p1980_p0 }
  0x59   : > { %1990 = shalt.err (!%p1987_p11)
}
  0x5a   : > { %s2658_s9 = smov 8   ;;  %s2659_s30 = smov 128  }
  0x5b   : > { %1808 = dma.hbm_to_vmem [thread:$0]  (!%p2656_p6), %s2615_s6, 1024, %s297_s29, [#allocation9], %s2659_s30, %s2659_s30, %s2658_s9  }
  0x5c   : > { %s2002_s28 = scalar_lea.vmem %s313_s22, 512  ;;  %p2660_p2 = pmov %p2657_p12 }
  0x5d   : > { %p2003_p5 = scmp.ne.s32.totalorder %s313_s22, %s2002_s28  ;;  %p2010_p12 = scmp.lt.s32.totalorder %s313_s22, %s313_s22 }
  0x5e   : > { %p2011_p7 = scmp.lt.s32.totalorder %s2002_s28, %s2002_s28 }
  0x5f   : > { %p2005_p13 = pnand %p2003_p5, %p2660_p2 }
  0x60   : > { %p2012_p0 = por %p2011_p7, %p2010_p12 }
  0x61   : > { %p2006_p1 = pneg %p2005_p13 }
  0x63   : > { %p2013_p3 = pnand %p2012_p0, %p2006_p1 }
  0x65   : > { %2016 = shalt.err (!%p2013_p3)
}
  0x66   : > { %1811 = dma.hbm_to_vmem [thread:$0]  (!%p2656_p6), %s2617_s8, 512, %s313_s22, [#allocation12], %s2659_s30, %s2659_s30, %s2658_s9  }
  0x67   : > { %s2661_s21 = sshll.u32 %s2149_s12, 7  ;;  %s2662_s0 = sld [smem:[#allocation24_spill]] }
  0x68   : > { %s2663_s16 = sshll.u32 %s2312_s18, 3  ;;  %s1633_s28 = sshll.u32 %s2149_s12, 4 }
  0x69   : > { %s330_s20 = scalar_lea.vmem [#allocation2], %s2663_s16  ;;  %s327_s25 = scalar_lea.sflag [#allocation3], %s2312_s18 }
  0x6a   : > { %s337_s26 = sshll.u32 %s330_s20, 4  ;;  %s338_s26 = int_to_ptr.vmem [resolvable:$true] %s337_s26 }
  0x6d   : > { %s2382_s27 = scalar_lea.hbm %s2662_s0, %s2661_s21  ;;  %s2022_s30 = scalar_lea.hbm %s2662_s0, 256 }
  0x6e   : > { %s2017_s23 = scalar_lea.hbm %s2382_s27, 128  ;;  %p2023_p11 = scmp.lt.s32.totalorder %s2382_s27, %s2662_s0 }
  0x6f   : > { %p2018_p4 = scmp.ne.s32.totalorder %s2382_s27, %s2017_s23  ;;  %p2024_p5 = scmp.lt.s32.totalorder %s2022_s30, %s2017_s23 }
  0x71   : > { %p2020_p8 = pnand %p2018_p4, %p2336_p10  ;;  %p2025_p2 = por %p2024_p5, %p2023_p11 }
  0x73   : > { %p2021_p6 = pneg %p2020_p8 }
  0x75   : > { %p2026_p13 = pnand %p2025_p2, %p2021_p6 }
  0x77   : > { %2029 = shalt.err (!%p2026_p13)
}
  0x78   : > { %s2030_s24 = scalar_lea.vmem %s338_s26, 128  ;;  %s2157_s16 = smov [#allocation2]  }
  0x79   : > { %p2031_p1 = scmp.ne.s32.totalorder %s338_s26, %s2030_s24  ;;  %s2035_s20 = sshll.u32 %s2157_s16, 4  ;;  %s2036_s20 = int_to_ptr.vmem [resolvable:$false] %s2035_s20 }
  0x7a   : > { %s2037_s1 = scalar_lea.vmem %s2036_s20, 256  ;;  %p2038_p0 = scmp.lt.s32.totalorder %s338_s26, %s2036_s20 }
  0x7b   : > { %p2033_p12 = pnand %p2031_p1, %p2336_p10  ;;  %p2039_p3 = scmp.lt.s32.totalorder %s2037_s1, %s2030_s24 }
  0x7d   : > { %p2034_p7 = pneg %p2033_p12  ;;  %p2040_p4 = por %p2039_p3, %p2038_p0 }
  0x7f   : > { %p2041_p8 = pnand %p2040_p4, %p2034_p7 }
  0x81   : > { %2044 = shalt.err (!%p2041_p8)
}
  0x82   : > { %1815 = dma.hbm_to_vmem [thread:$0]  (!%p2316_p9), %s2382_s27, 128, %s338_s26, %s327_s25  }
  0x83   : > { %s370_s9 = scalar_lea.hbm %s2611_s2, %s1633_s28  ;;  %s365_s30 = scalar_lea.vmem [#allocation7], %s2312_s18 }
  0x84   : > { %s372_s21 = sshll.u32 %s365_s30, 4  ;;  %s2045_s29 = scalar_lea.hbm %s370_s9, 16  ;;  %s373_s21 = int_to_ptr.vmem [resolvable:$true] %s372_s21 }
  0x85   : > { %p2046_p6 = scmp.ne.s32.totalorder %s370_s9, %s2045_s29  ;;  %s2050_s16 = scalar_lea.hbm %s2611_s2, 32 }
  0x86   : > { %p2051_p2 = scmp.lt.s32.totalorder %s370_s9, %s2611_s2  ;;  %p2052_p13 = scmp.lt.s32.totalorder %s2050_s16, %s2045_s29 }
  0x87   : > { %p2048_p11 = pnand %p2046_p6, %p2336_p10 }
  0x88   : > { %p2053_p1 = por %p2052_p13, %p2051_p2 }
  0x89   : > { %p2049_p5 = pneg %p2048_p11 }
  0x8b   : > { %p2054_p12 = pnand %p2053_p1, %p2049_p5 }
  0x8d   : > { %2057 = shalt.err (!%p2054_p12)
}
  0x8e   : > { %s2058_s18 = scalar_lea.vmem %s373_s21, 16  ;;  %s2158_s27 = smov [#allocation7]  }
  0x8f   : > { %p2059_p7 = scmp.ne.s32.totalorder %s373_s21, %s2058_s18  ;;  %s2063_s26 = sshll.u32 %s2158_s27, 4  ;;  %s2064_s26 = int_to_ptr.vmem [resolvable:$false] %s2063_s26 }
  0x90   : > { %s2065_s28 = scalar_lea.vmem %s2064_s26, 32  ;;  %p2066_p4 = scmp.lt.s32.totalorder %s373_s21, %s2064_s26 }
  0x91   : > { %p2061_p0 = pnand %p2059_p7, %p2336_p10  ;;  %p2067_p8 = scmp.lt.s32.totalorder %s2065_s28, %s2058_s18 }
  0x93   : > { %p2062_p3 = pneg %p2061_p0  ;;  %p2068_p6 = por %p2067_p8, %p2066_p4 }
  0x95   : > { %p2069_p11 = pnand %p2068_p6, %p2062_p3 }
  0x97   : > { %2072 = shalt.err (!%p2069_p11)
}
  0x98   : > { %1821 = dma.hbm_to_vmem [thread:$0]  (!%p2316_p9), %s370_s9, 16, %s373_s21, %s2330_s3  }
  0x99   : > { %p2664_p5 = scmp.ne.s32.totalorder %s2647_s17, 0 }
  0x9a   : > { %s2424_s0 = sand.u32 (!%p2664_p5), 1, %s2141_s10   ;;  %p2665_p10 = scmp.ne.s32.totalorder (!%p2664_p5), %s2644_s15, 0 }
  0x9b   : > { %381 = sbr.rel (%p2664_p5) target bundleno = 2672 (0xa70), region = 56  ;;  %s2427_s11 = sshll.u32 (!%p2664_p5), %s2424_s0, 3 }
  0x9c   : > { %s384_s25 = scalar_lea.sflag (!%p2664_p5), [#allocation3], %s2424_s0  ;;  %s387_s23 = scalar_lea.vmem (!%p2664_p5), [#allocation2], %s2427_s11 }
  0xa0   : > { %2116 = dma.done.wait (%p2665_p10), %s384_s25, 128  }
  0xa1   : > { %2118 = vsyncadd (%p2665_p10), %s384_s25, 4294967168  ;;  %s392_s3 = sand.u32 1, %s2247_s13   ;;  %s396_s19 = scalar_lea.vmem [#allocation5], %s2427_s11 }
  0xa2   : > { %s393_s17 = scalar_lea.sflag [#allocation6], %s392_s3 }
  0xa3   : > { %2120 = dma.done.wait (%p2665_p10), %s393_s17, 144  }
  0xa4   : > { %2122 = vsyncadd (%p2665_p10), %s393_s17, 4294967152  ;;  %s404_s22 = scalar_lea.vmem [#allocation7], %s2424_s0  ;;  %p2666_p9 = scmp.eq.s32.totalorder %s2247_s13, 0 }
  0xa6   : > { %2124 = dma.done.wait (%p2666_p9), [#allocation9], 1536   ;;  %p2667_p2 = pmov %p2666_p9 }
  0xa8   : > { %2126 = vsyncadd (%p2667_p2), [#allocation9], 4294965760  ;;  %p2668_p13 = pmov %p2667_p2 }
  0xa9   : > { %p2669_p1 = pmov %p2667_p2 }
  0xaa   : > { %2128 = dma.done.wait (%p2668_p13), [#allocation12], 512  }
  0xab   : > { %2130 = vsyncadd (%p2669_p1), [#allocation12], 4294966784  ;;  %vm466_vm0 = vcmask 261120   ;;  %v2450_v0 = vld [vmem:[%s387_s23] sm:$0xff]  ;;  %v2159_v8 = vmov 0.0   ;;  %v493_v9 = vld [vmem:[#allocation8 + $0x10] sm:$0xff] }
  0xac   : > { %v467_v1 = vsel %vm466_vm0, %v2450_v0, 0.0  ;;  %v494_v7 = vld [vmem:[#allocation8 + $0x18] sm:$0xff]  ;;  %1701 = vmatprep.subr.mxu0 %v2159_v8  ;;  %vm2160_vm1 = vmmov 0   ;;  %1712 = vmatprep.subr.mxu1 %v2159_v8  ;;  %v492_v10 = vld [vmem:[#allocation8 + $0x8] sm:$0xff]  ;;  %v491_v11 = vld [vmem:[#allocation8] sm:$0xff]  ;;  %s2161_s24 = smov 64  }
  0xad   : > { %468 = vadd.xlane.f32.xlu0 %v467_v1  ;;  %1709 = vmatprep.mubr.msk.f32.mxu0 %vm2160_vm1, %v2159_v8  ;;  %v1641_v16 = vld [vmem:[%s2614_s5] ss:$0 sm:$0xff]  ;;  %v1642_v18 = vld [vmem:[%s2614_s5 + $0x1] ss:$0 sm:$0xff]  ;;  %s2162_s16 = smov 96   ;;  %s2163_s20 = smov 88  }
  0xae   : > { %1702 = vmatpush3.msra.mxu0 %v494_v7  ;;  %1714 = vmatprep.mubr.msk.f32.mxu1 %vm2160_vm1, %v2159_v8  ;;  %v1643_v21 = vld [vmem:[%s2613_s4] ss:$0 sm:$0xff]  ;;  %vm581_vm2 = vcmask 64512   ;;  %v575_v27 = vld [vmem:[%s396_s19] sm:$0xff]  ;;  %s2164_s18 = smov 80   ;;  %s2165_s27 = smov 120  }
  0xaf   : > { %1703 = vmatprep.subr.mxu0 %v2159_v8  ;;  %v576_v28 = vsub.f32 1.0, %v575_v27  ;;  %s2166_s26 = smov 112   ;;  %s2167_s28 = smov 72   ;;  %v1268_v27 = vld [vmem:[#allocation10 + $0x38] sm:$0xff]  ;;  %vm1270_vm3 = vcmask 523264   ;;  %vm1251_vm4 = vcmask 130048  }
  0xb0   : > { %1704 = vmatpush3.msra.mxu0 %v493_v9  ;;  %s2168_s25 = smov 104   ;;  %s2169_s23 = smov 48   ;;  %vm1253_vm5 = vcmask 195584  }
  0xb1   : > { %1705 = vmatprep.subr.mxu0 %v2159_v8  ;;  %v577_v29 = vmul.f32 -100000.0, %v576_v28  ;;  %s2170_s3 = smov 56   ;;  %s2171_s17 = smov 40   ;;  %v1267_v28 = vld [vmem:[#allocation10 + $0x30] sm:$0xff] }
  0xb2   : > { %1706 = vmatpush3.msra.mxu0 %v492_v10  ;;  %s2172_s19 = smov 8   ;;  %s2174_s15 = smov 24  }
  0xb3   : > { %1707 = vmatprep.subr.mxu0 %v2159_v8  ;;  %p2671_p7 = scmp.ne.s32.totalorder %s2652_s14, 0 }
  0xb4   : > { %1708 = vmatpush3.msra.mxu0 %v491_v11 }
  0xb5   : > { %1732 = vmatprep.subr.mxu0 %v2159_v8 }
 0x136   : > { %v469_v2 = vpop.xlane.xlu0 %468 }
 0x137   : > { %v471_v3 = vmul.f32 0.03125, %v469_v2 }
 0x139   : > { %v472_v4 = vsub.f32 %v2450_v0, %v471_v3 }
 0x13b   : > { %v473_v5 = vmul.f32 %v472_v4, %v472_v4 }
 0x13d   : > { %v474_v6 = vsel %vm466_vm0, %v473_v5, 0.0 }
 0x13e   : > { %475 = vadd.xlane.f32.xlu0 %v474_v6 }
 0x1c7   : > { %v476_v12 = vpop.xlane.xlu0 %475 }
 0x1c8   : > { %v477_v13 = vmul.f32 0.03125, %v476_v12 }
 0x1ca   : > { %v478_v14 = vadd.f32 1e-05, %v477_v13 }
 0x1cc   : > { %1887 = vrsqrt.f32 %v478_v14 }
 0x1d9   : > { %v1888_v15 = vpop.eup %1887 }
 0x1da   : > { %v480_v17 = vmul.f32 %v1888_v15, %v472_v4 }
 0x1dc   : > { %v485_v19 = vmul.f32 %v1641_v16, %v480_v17 }
 0x1de   : > { %v490_v20 = vadd.f32 %v1642_v18, %v485_v19 }
 0x1e0   : > { %1710 = vmatmul.mubr.msk.f32.vlgmr.msra.gmra.mxu0 %vm466_vm0, %v490_v20 }
 0x1e1   : > { %1734 = vmatprep.mubr.msk.f32.mxu0 %vm2160_vm1, %v2159_v8 }
 0x2a0   : > { %v571_v22 = vpop.f32.mrf.mxu0 }
 0x2a1   : > { %v2478_v23 = vadd.f32 %v1643_v21, %v571_v22 }
 0x2a2   : > { %v1711_v24 = vpop.f32.mrf.mxu0 }
 0x2a3   : > { %667 = vrot.lane.b32.xlu0 %v2478_v23, %s2161_s24  ;;  %579 = vrot.lane.b32.xlu1 %v2478_v23, %s2162_s16 }
 0x2a7   : > { %745 = vrot.lane.b32.xlu0 %v2478_v23, %s2163_s20 }
 0x315   : > { %v580_v25 = vpop.permute.xlu1 %579  ;;  %v668_v26 = vpop.permute.xlu0 %667 }
 0x316   : > { %1713 = vmatpush3.xpose.msk.msra.mxu1 %vm581_vm2, %v580_v25 }
 0x317   : > { %1717 = vmatprep.subr.mxu1 %v2159_v8 }
 0x319   : > { %1715 = vmatmul.mubr.msk.f32.vlgmr.msra.gmra.mxu1 %vm581_vm2, %v2478_v23  ;;  %v746_v40 = vpop.permute.xlu0 %745 }
 0x31a   : > { %1718 = vmatpush3.msra.mxu1 %v668_v26  ;;  %1719 = vmatprep.mubr.msk.f32.mxu1 %vm2160_vm1, %v2159_v8 }
 0x31b   : > { %1722 = vmatprep.subr.mxu1 %v2159_v8 }
 0x3d9   : > { %v652_v30 = vpop.f32.mrf.mxu1 }
 0x3da   : > { %v653_v31 = vadd.f32 %v652_v30, %v577_v29  ;;  %v1265_v30 = vld [vmem:[#allocation10 + $0x20] sm:$0xff] }
 0x3db   : > { %v1716_v32 = vpop.f32.mrf.mxu1 }
 0x3dc   : > { %v656_v33 = vsel %vm581_vm2, %v653_v31, -inf  ;;  %v1255_v32 = vld [vmem:[%s404_s22] sm:$0x1]  ;;  %s2173_s22 = smov 16  }
 0x3dd   : > { %657 = vmax.xlane.f32.xlu1 %v656_v33  ;;  %v1256_v33 = vmul.f32 0.5, %v1255_v32 }
 0x3ee   : > { %910 = vrot.lane.b32.xlu1 %v2478_v23, %s2164_s18  ;;  %s1663_s18 = sshll.u32 %s2247_s13, 7  ;;  %s2175_s13 = smov [#allocation13]  }
 0x466   : > { %v658_v34 = vpop.xlane.xlu1 %657 }
 0x467   : > { %v659_v35 = vsub.f32 %v653_v31, %v658_v34  ;;  %v1264_v31 = vld [vmem:[#allocation10 + $0x18] sm:$0xff] }
 0x469   : > { %v660_v36 = vmul.f32 1.442695, %v659_v35  ;;  %v1263_v35 = vld [vmem:[#allocation10 + $0x10] sm:$0xff] }
 0x46a   : > { %v911_v37 = vpop.permute.xlu1 %910 }
 0x46b   : > { %1889 = vpow2.f32 %v660_v36  ;;  %1733 = vmatpush3.xpose.msk.msra.mxu0 %vm581_vm2, %v911_v37  ;;  %v1262_v36 = vld [vmem:[#allocation10 + $0x8] sm:$0xff] }
 0x46c   : > { %1742 = vmatprep.subr.mxu0 %v2159_v8 }
 0x478   : > { %v1890_v38 = vpop.eup %1889 }
 0x479   : > { %v662_v39 = vsel %vm581_vm2, %v1890_v38, 0.0 }
 0x47a   : > { %663 = vadd.xlane.f32.xlu0 %v662_v39  ;;  %v1261_v39 = vld [vmem:[#allocation10] sm:$0xff] }
 0x490   : > { %743 = vrot.lane.b32.xlu0 %v2478_v23, %s2165_s27  ;;  %s459_s27 = scalar_lea.vmem [#allocation13], %s2427_s11  ;;  %s2077_s11 = sshll.u32 %s2175_s13, 4  ;;  %s2078_s11 = int_to_ptr.vmem [resolvable:$false] %s2077_s11 }
 0x494   : > { %908 = vrot.lane.b32.xlu0 %v2478_v23, %s2166_s26  ;;  %s1484_s26 = sshll.u32 %s459_s27, 4  ;;  %s1485_s26 = int_to_ptr.vmem [resolvable:$true] %s1484_s26 }
 0x495   : > { %p2080_p4 = scmp.lt.s32.totalorder %s1485_s26, %s2078_s11 }
 0x498   : > { %1075 = vrot.lane.b32.xlu0 %v2478_v23, %s2167_s28 }
 0x49c   : > { %1073 = vrot.lane.b32.xlu0 %v2478_v23, %s2168_s25 }
 0x503   : > { %v664_v41 = vpop.xlane.xlu0 %663 }
 0x504   : > { %1891 = vrcp.f32 %v664_v41 }
 0x507   : > { %v744_v42 = vpop.permute.xlu0 %743 }
 0x50b   : > { %v909_v43 = vpop.permute.xlu0 %908 }
 0x50c   : > { %1735 = vmatmul.mubr.msk.f32.vlgmr.msra.gmra.mxu0 %vm581_vm2, %v909_v43 }
 0x50d   : > { %1744 = vmatprep.mubr.msk.f32.mxu0 %vm2160_vm1, %v2159_v8 }
 0x50f   : > { %v1076_v44 = vpop.permute.xlu0 %1075 }
 0x510   : > { %1743 = vmatpush3.xpose.msk.msra.mxu0 %vm581_vm2, %v1076_v44 }
 0x511   : > { %v1892_v45 = vpop.eup %1891  ;;  %1752 = vmatprep.subr.mxu0 %v2159_v8 }
 0x512   : > { %v666_v46 = vmul.f32 %v1892_v45, %v1890_v38 }
 0x513   : > { %v1074_v47 = vpop.permute.xlu0 %1073 }
 0x514   : > { %1720 = vmatmul.mubr.msk.f32.vlgmr.msra.gmra.mxu1 %vm581_vm2, %v666_v46  ;;  %1745 = vmatmul.mubr.msk.f32.vlgmr.msra.gmra.mxu0 %vm581_vm2, %v1074_v47 }
 0x515   : > { %1723 = vmatpush3.xpose.msk.msra.mxu1 %vm581_vm2, %v746_v40  ;;  %1724 = vmatprep.mubr.msk.f32.mxu1 %vm2160_vm1, %v2159_v8 }
 0x516   : > { %1727 = vmatprep.subr.mxu1 %v2159_v8  ;;  %1768 = vmatprep.mubr.msk.f32.mxu0 %vm2160_vm1, %v2159_v8 }
 0x517   : > { %1753 = vmatpush3.msra.mxu0 %v1268_v27  ;;  %v1660_v27 = vld [vmem:[%s2614_s5 + $0x4] ss:$0 sm:$0xff] }
 0x518   : > { %1725 = vmatmul.mubr.msk.f32.vlgmr.msra.gmra.mxu1 %vm581_vm2, %v744_v42  ;;  %1754 = vmatprep.subr.mxu0 %v2159_v8 }
 0x519   : > { %1729 = vmatprep.mubr.msk.f32.mxu1 %vm2160_vm1, %v2159_v8  ;;  %1755 = vmatpush3.msra.mxu0 %v1267_v28 }
 0x51a   : > { %1756 = vmatprep.subr.mxu0 %v2159_v8 }
 0x5cc   : > { %v982_v48 = vpop.f32.mrf.mxu0 }
 0x5cd   : > { %v983_v49 = vadd.f32 %v982_v48, %v577_v29 }
 0x5ce   : > { %v1736_v50 = vpop.f32.mrf.mxu0 }
 0x5cf   : > { %v986_v51 = vsel %vm581_vm2, %v983_v49, -inf }
 0x5d0   : > { %987 = vmax.xlane.f32.xlu1 %v986_v51 }
 0x5d4   : > { %v2519_v52 = vpop.f32.mrf.mxu1  ;;  %v1147_v53 = vpop.f32.mrf.mxu0 }
 0x5d5   : > { %v1148_v59 = vadd.f32 %v1147_v53, %v577_v29 }
 0x5d6   : > { %v1721_v54 = vpop.f32.mrf.mxu1  ;;  %v1746_v55 = vpop.f32.mrf.mxu0 }
 0x5d7   : > { %v1151_v61 = vsel %vm581_vm2, %v1148_v59, -inf  ;;  %v1368_v55 = vlaneseq }
 0x5d8   : > { %v817_v56 = vpop.f32.mrf.mxu1 }
 0x5d9   : > { %v818_v57 = vadd.f32 %v817_v56, %v577_v29  ;;  %v1266_v29 = vld [vmem:[#allocation10 + $0x28] sm:$0xff]  ;;  %v1369_v56 = vshrl.u32 %v1368_v55, 7 }
 0x5da   : > { %v1726_v58 = vpop.f32.mrf.mxu1  ;;  %1757 = vmatpush3.msra.mxu0 %v1266_v29 }
 0x5db   : > { %v821_v60 = vsel %vm581_vm2, %v818_v57, -inf  ;;  %1758 = vmatprep.subr.mxu0 %v2159_v8  ;;  %v1370_v58 = vsub.s32 0, %v1369_v56 }
 0x5dc   : > { %822 = vmax.xlane.f32.xlu0 %v821_v60  ;;  %1759 = vmatpush3.msra.mxu0 %v1265_v30 }
 0x5dd   : > { %1760 = vmatprep.subr.mxu0 %v2159_v8 }
 0x5de   : > { %1761 = vmatpush3.msra.mxu0 %v1264_v31 }
 0x5df   : > { %1762 = vmatprep.subr.mxu0 %v2159_v8 }
 0x5e0   : > { %1152 = vmax.xlane.f32.xlu0 %v1151_v61  ;;  %1763 = vmatpush3.msra.mxu0 %v1263_v35 }
 0x5e1   : > { %1764 = vmatprep.subr.mxu0 %v2159_v8 }
 0x5e2   : > { %1765 = vmatpush3.msra.mxu0 %v1262_v36 }
 0x5e3   : > { %1766 = vmatprep.subr.mxu0 %v2159_v8 }
 0x5e4   : > { %1767 = vmatpush3.msra.mxu0 %v1261_v39 }
 0x659   : > { %v988_v62 = vpop.xlane.xlu1 %987 }
 0x65a   : > { %v989_v63 = vsub.f32 %v983_v49, %v988_v62 }
 0x65c   : > { %v990_v1 = vmul.f32 1.442695, %v989_v63 }
 0x65e   : > { %1893 = vpow2.f32 %v990_v1 }
 0x665   : > { %v823_v2 = vpop.xlane.xlu0 %822 }
 0x666   : > { %v824_v3 = vsub.f32 %v818_v57, %v823_v2  ;;  %v1269_v57 = vld [vmem:[%s2616_s7] sm:$0x1] }
 0x668   : > { %v825_v4 = vmul.f32 1.442695, %v824_v3 }
 0x669   : > { %v1153_v5 = vpop.xlane.xlu0 %1152 }
 0x66a   : > { %1895 = vpow2.f32 %v825_v4  ;;  %v1154_v6 = vsub.f32 %v1148_v59, %v1153_v5 }
 0x66b   : > { %v1894_v7 = vpop.eup %1893 }
 0x66c   : > { %v1155_v9 = vmul.f32 1.442695, %v1154_v6  ;;  %v992_v10 = vsel %vm581_vm2, %v1894_v7, 0.0  ;;  %v1390_v6 = vld [vmem:[#allocation11 + $0x18] sm:$0xff] }
 0x66d   : > { %993 = vadd.xlane.f32.xlu0 %v992_v10  ;;  %v1387_v10 = vld [vmem:[#allocation11] sm:$0xff] }
 0x66e   : > { %1897 = vpow2.f32 %v1155_v9  ;;  %v1388_v9 = vld [vmem:[#allocation11 + $0x8] sm:$0xff] }
 0x677   : > { %v1896_v11 = vpop.eup %1895 }
 0x678   : > { %v827_v12 = vsel %vm581_vm2, %v1896_v11, 0.0 }
 0x679   : > { %828 = vadd.xlane.f32.xlu0 %v827_v12 }
 0x67b   : > { %v1898_v13 = vpop.eup %1897 }
 0x67c   : > { %v1157_v14 = vsel %vm581_vm2, %v1898_v13, 0.0 }
 0x67d   : > { %1158 = vadd.xlane.f32.xlu1 %v1157_v14 }
 0x68e   : > { %997 = vrot.lane.b32.xlu1 %v2478_v23, %s2169_s23  ;;  %s2670_s23 = sld [smem:[#allocation27_spill]] }
 0x68f   : > { %832 = vrot.lane.b32.xlu0 %v2478_v23, %s2170_s3 }
 0x692   : > { %1162 = vrot.lane.b32.xlu1 %v2478_v23, %s2171_s17  ;;  %s1471_s17 = scalar_lea.sflag [#allocation4], %s2424_s0 }
 0x694   : > { %s1482_s3 = scalar_lea.hbm %s2670_s23, %s1663_s18 }
 0x6f6   : > { %v994_v15 = vpop.xlane.xlu0 %993 }
 0x702   : > { %v829_v16 = vpop.xlane.xlu0 %828 }
 0x703   : > { %1899 = vrcp.f32 %v829_v16 }
 0x704   : > { %1901 = vrcp.f32 %v994_v15  ;;  %v1658_v15 = vld [vmem:[%s2614_s5 + $0x2] ss:$0 sm:$0xff] }
 0x706   : > { %v1159_v17 = vpop.xlane.xlu1 %1158  ;;  %v833_v18 = vpop.permute.xlu0 %832 }
 0x707   : > { %1728 = vmatpush3.msra.mxu1 %v833_v18  ;;  %1903 = vrcp.f32 %v1159_v17  ;;  %v1659_v17 = vld [vmem:[%s2614_s5 + $0x3] ss:$0 sm:$0xff] }
 0x708   : > { %1737 = vmatprep.subr.mxu1 %v2159_v8  ;;  %1905 = vtanh.f32 %v1256_v33 }
 0x70a   : > { %v998_v20 = vpop.permute.xlu1 %997 }
 0x70e   : > { %v1163_v25 = vpop.permute.xlu1 %1162 }
 0x710   : > { %v1900_v19 = vpop.eup %1899 }
 0x711   : > { %v831_v21 = vmul.f32 %v1900_v19, %v1896_v11  ;;  %v1902_v22 = vpop.eup %1901 }
 0x712   : > { %v996_v23 = vmul.f32 %v1902_v22, %v1894_v7  ;;  %v1389_v7 = vld [vmem:[#allocation11 + $0x10] sm:$0xff] }
 0x713   : > { %1730 = vmatmul.mubr.msk.f32.vlgmr.msra.gmra.mxu1 %vm581_vm2, %v831_v21 }
 0x714   : > { %1738 = vmatpush3.msra.mxu1 %v998_v20  ;;  %1739 = vmatprep.mubr.msk.f32.mxu1 %vm2160_vm1, %v2159_v8  ;;  %v1904_v24 = vpop.eup %1903 }
 0x715   : > { %1747 = vmatprep.subr.mxu1 %v2159_v8  ;;  %v1161_v26 = vmul.f32 %v1904_v24, %v1898_v13  ;;  %v1906_v34 = vpop.eup %1905 }
 0x716   : > { %v1258_v37 = vadd.f32 1.0, %v1906_v34 }
 0x717   : > { %1740 = vmatmul.mubr.msk.f32.vlgmr.msra.gmra.mxu1 %vm581_vm2, %v996_v23 }
 0x718   : > { %1748 = vmatpush3.msra.mxu1 %v1163_v25  ;;  %1749 = vmatprep.mubr.msk.f32.mxu1 %vm2160_vm1, %v2159_v8  ;;  %v1259_v38 = vmul.f32 0.5, %v1258_v37 }
 0x719   : > { %1771 = vmatprep.subr.mxu1 %v2159_v8 }
 0x71a   : > { %v1260_v40 = vmul.f32 %v1259_v38, %v1255_v32 }
 0x71b   : > { %1750 = vmatmul.mubr.msk.f32.vlgmr.msra.gmra.mxu1 %vm581_vm2, %v1161_v26 }
 0x71c   : > { %1779 = vmatprep.mubr.msk.f32.mxu1 %vm2160_vm1, %v2159_v8  ;;  %1769 = vmatmul.mubr.msk.f32.vlgmr.msra.gmra.mxu0 %vm1270_vm3, %v1260_v40 }
 0x71d   : > { %1772 = vmatpush3.msra.mxu1 %v1390_v6 }
 0x71e   : > { %1773 = vmatprep.subr.mxu1 %v2159_v8 }
 0x71f   : > { %1774 = vmatpush3.msra.mxu1 %v1389_v7 }
 0x720   : > { %1775 = vmatprep.subr.mxu1 %v2159_v8 }
 0x721   : > { %1776 = vmatpush3.msra.mxu1 %v1388_v9 }
 0x722   : > { %1777 = vmatprep.subr.mxu1 %v2159_v8 }
 0x723   : > { %1778 = vmatpush3.msra.mxu1 %v1387_v10 }
 0x7d3   : > { %v904_v41 = vpop.f32.mrf.mxu1 }
 0x7d4   : > { %1239 = vrot.lane.b32.xlu1 %v904_v41, %s2172_s19  ;;  %s2073_s19 = scalar_lea.vmem %s1485_s26, 128 }
 0x7d5   : > { %v1731_v42 = vpop.f32.mrf.mxu1  ;;  %p2074_p12 = scmp.ne.s32.totalorder %s1485_s26, %s2073_s19 }
 0x7d7   : > { %v1069_v43 = vpop.f32.mrf.mxu1  ;;  %p2075_p0 = pnand %p2074_p12, %p2671_p7 }
 0x7d8   : > { %1243 = vrot.lane.b32.xlu0 %v1069_v43, %s2173_s22  ;;  %s2079_s22 = scalar_lea.vmem %s2078_s11, 256 }
 0x7d9   : > { %v1741_v44 = vpop.f32.mrf.mxu1  ;;  %p2076_p3 = pneg %p2075_p0  ;;  %p2081_p8 = scmp.lt.s32.totalorder %s2079_s22, %s2073_s19 }
 0x7db   : > { %v1234_v45 = vpop.f32.mrf.mxu1  ;;  %p2082_p6 = por %p2081_p8, %p2080_p4 }
 0x7dc   : > { %1247 = vrot.lane.b32.xlu1 %v1234_v45, %s2174_s15  ;;  %v1340_v59 = vpop.f32.mrf.mxu0 }
 0x7dd   : > { %v1751_v46 = vpop.f32.mrf.mxu1  ;;  %v1341_v60 = vadd.f32 %v1340_v59, %v1269_v57  ;;  %p2083_p11 = pnand %p2082_p6, %p2076_p3 }
 0x7de   : > { %v1770_v61 = vpop.f32.mrf.mxu0 }
 0x7df   : > { %v1367_v62 = vadd.f32 1.0, %v1341_v60  ;;  %v1376_v63 = vrot.slane %v1341_v60, %v1370_v58 }
 0x846   : > { %v1240_v47 = vpop.permute.xlu1 %1239 }
 0x847   : > { %v1250_v49 = vsel %vm581_vm2, %v2519_v52, %v1240_v47  ;;  %v1371_v52 = vrot.slane %v1367_v62, %v1370_v58 }
 0x84a   : > { %v1244_v48 = vpop.permute.xlu0 %1243 }
 0x84b   : > { %v1252_v50 = vsel %vm1251_vm4, %v1250_v49, %v1244_v48 }
 0x84e   : > { %v1248_v51 = vpop.permute.xlu1 %1247 }
 0x84f   : > { %v1254_v53 = vsel %vm1253_vm5, %v1252_v50, %v1248_v51 }
 0x850   : > { %v1344_v54 = vsel %vm466_vm0, %v1254_v53, 0.0 }
 0x851   : > { %1345 = vadd.xlane.f32.xlu0 %v1344_v54 }
 0x867   : > { %1378 = vrot.lane.b32.xlu0 %v1376_v63, %s2162_s16 }
 0x8da   : > { %v1346_v1 = vpop.xlane.xlu0 %1345 }
 0x8db   : > { %v1347_v2 = vmul.f32 0.03125, %v1346_v1 }
 0x8dd   : > { %v1348_v3 = vsub.f32 %v1254_v53, %v1347_v2 }
 0x8de   : > { %v1379_v8 = vpop.permute.xlu0 %1378 }
 0x8df   : > { %v1349_v4 = vmul.f32 %v1348_v3, %v1348_v3 }
 0x8e1   : > { %v1350_v5 = vsel %vm466_vm0, %v1349_v4, 0.0 }
 0x8e2   : > { %1351 = vadd.xlane.f32.xlu1 %v1350_v5 }
 0x96b   : > { %v1352_v11 = vpop.xlane.xlu1 %1351 }
 0x96c   : > { %v1353_v12 = vmul.f32 0.03125, %v1352_v11 }
 0x96e   : > { %v1354_v13 = vadd.f32 1e-05, %v1353_v12 }
 0x970   : > { %1907 = vrsqrt.f32 %v1354_v13 }
 0x97d   : > { %v1908_v14 = vpop.eup %1907 }
 0x97e   : > { %v1356_v16 = vmul.f32 %v1908_v14, %v1348_v3 }
 0x980   : > { %v1361_v18 = vmul.f32 %v1658_v15, %v1356_v16 }
 0x982   : > { %v1366_v19 = vadd.f32 %v1659_v17, %v1361_v18 }
 0x984   : > { %v1372_v20 = vmul.f32 %v1371_v52, %v1366_v19 }
 0x986   : > { %v1381_v21 = vadd.f32 %v1379_v8, %v1372_v20 }
 0x988   : > { %v1382_v22 = vmul.f32 0.5, %v1381_v21 }
 0x98a   : > { %1909 = vtanh.f32 %v1382_v22 }
 0x997   : > { %v1910_v23 = vpop.eup %1909 }
 0x998   : > { %v1384_v24 = vadd.f32 1.0, %v1910_v23 }
 0x99a   : > { %v1385_v25 = vmul.f32 0.5, %v1384_v24 }
 0x99c   : > { %v1386_v26 = vmul.f32 %v1385_v25, %v1381_v21 }
 0x99e   : > { %1780 = vmatmul.mubr.msk.f32.vlgmr.msra.gmra.mxu1 %vm466_vm0, %v1386_v26 }
 0xa5e   : > { %v1464_v28 = vpop.f32.mrf.mxu1 }
 0xa5f   : > { %v1465_v29 = vadd.f32 %v1660_v27, %v1464_v28 }
 0xa60   : > { %v1781_v30 = vpop.f32.mrf.mxu1 }
 0xa61   : > { %v1468_v31 = vadd.f32 %v1465_v29, %v2450_v0 }
 0xa63   : > { %1469 = vst.msk [vmem:[%s459_s27] sm:$0xff] %vm466_vm0, %v1468_v31 }
 0xa64   : > { %2086 = shalt.err (!%p2083_p11)
}
 0xa65   : > { %s2087_s15 = scalar_lea.hbm %s1482_s3, 128  ;;  %s2091_s30 = scalar_lea.hbm %s2670_s23, 256 }
 0xa66   : > { %p2088_p5 = scmp.ne.s32.totalorder %s1482_s3, %s2087_s15  ;;  %p2092_p2 = scmp.lt.s32.totalorder %s1482_s3, %s2670_s23 }
 0xa67   : > { %p2093_p13 = scmp.lt.s32.totalorder %s2091_s30, %s2087_s15 }
 0xa68   : > { %p2089_p10 = pnand %p2088_p5, %p2671_p7 }
 0xa69   : > { %p2094_p1 = por %p2093_p13, %p2092_p2 }
 0xa6a   : > { %p2090_p9 = pneg %p2089_p10 }
 0xa6c   : > { %p2095_p12 = pnand %p2094_p1, %p2090_p9 }
 0xa6e   : > { %2098 = shalt.err (!%p2095_p12)
}
 0xa6f   : > { %1800 = dma.vmem_to_hbm [thread:$0]  (%p2671_p7), %s1485_s26, 128, %s1482_s3, %s1471_s17  }
 0xa70 PF: > { %s2672_s1 = sld [smem:[#allocation19_spill]]  ;;  %p2675_p3 = scmp.ge.s32.totalorder %s2149_s12, 2 }
 0xa71   : > { %s2673_s24 = sld [smem:[#allocation21_spill]] }
 0xa76   : > { %s1496_s16 = sand.u32 1, %s2672_s1  }
 0xa77   : > { %p2674_p0 = scmp.ne.s32.totalorder %s2673_s24, 0  ;;  %s1497_s20 = scalar_lea.sflag [#allocation4], %s1496_s16 }
 0xa79   : > { %p1823_p4 = pnand %p2675_p3, %p2674_p0 }
 0xa7b   : > { %p1824_p8 = pneg %p1823_p4 }
 0xa7d   : > { %2132 = dma.done.wait (%p1824_p8), %s1497_s20, 128  }
 0xa7e   : > { %2134 = vsyncadd (%p1824_p8), %s1497_s20, 4294967168  ;;  %s2676_s12 = sld [smem:[#allocation22_spill]]  ;;  %s2679_s30 = smov %s2141_s10 }
 0xa7f   : > { %s2677_s18 = sld [smem:[#allocation20_spill]] }
 0xa80   : > { %s2678_s11 = sld [smem:[#allocation23_spill]] }
 0xa84   : > { %p27_p6 = scmp.ge.s32.totalorder %s2676_s12, 4  }
 0xa85   : > { %s2680_s10 = smov %s2677_s18 }
 0xa86   :  { %29 = sbr.rel (!%p27_p6) target bundleno = 14 (0xe), region = 137 }
 0xa8b   :  { %1502 = vsyncpa [#allocation3], 1 }
 0xa8c   :  { %1504 = vsyncpa [#allocation3 + $0x1], 1 }
 0xa8d   :  { %1505 = vsyncpa [#allocation6], 1 }
 0xa8e   :  { %1507 = vsyncpa [#allocation6 + $0x1], 1 }
 0xa8f   :  { %1508 = vsyncpa [#allocation9], 1 }
 0xa90   :  { %1509 = vsyncpa [#allocation12], 1 }
 0xa91   :  { %1510 = vsyncpa [#allocation4], 1 }
 0xa92   :  { %1512 = vsyncpa [#allocation4 + $0x1], 1 }

</bundles_post_ra>
